<compile_context>
chip_gen: v5e
topology: v5e:2x2
jax: 0.10.0
libtpu: 0.0.40
codegen_flags: <defaults>
</compile_context>

<pallas_src>
import functools

import jax
import jax.numpy as jnp
from jax.experimental import pallas as pl
from jax.experimental.pallas import tpu as pltpu


# Fused dimensions.
H1 = 128          # per-head hidden 1
H2 = 64           # per-head hidden 2 (no padding)
N_HEADS = 3       # policy, var, value
OUT_PAD = 128     # packed lane-dense output width
MAX_TILE = 2048   # max batch rows per grid step


# ---------------------------------------------------------------------------
# Kernel
# ---------------------------------------------------------------------------
def _ppo_kernel(obs_ref, w1, b1, w2, b2, w3, b3, out_ref, *, eps, n_actions):
    # Activations in bf16 for the MXU; accumulate in f32.
    x = obs_ref[...].astype(jnp.bfloat16)

    # Layer 1: one wide matmul for all three heads: [bt, S] @ [S, 384].
    h1 = jnp.dot(x, w1[...], preferred_element_type=jnp.float32) + b1[...]
    h1 = jnp.maximum(h1, 0.0).astype(jnp.bfloat16)

    # Layer 2: block-diagonal fused matmul (no zero padding): [bt,384] @ [384,192].
    h2 = jnp.dot(h1, w2[...], preferred_element_type=jnp.float32) + b2[...]
    h2 = jnp.maximum(h2, 0.0).astype(jnp.bfloat16)

    # Layer 3: block-diagonal into a single 128-lane packed slab: [bt,192] @ [192,128].
    z = jnp.dot(h2, w3[...], preferred_element_type=jnp.float32) + b3[...]

    # Per-lane epilogue with ONE transcendental pass:
    #   lanes [0, n)   -> tanh(z) = 2*sigmoid(2z) - 1   (policy mean)
    #   lanes [n, 2n)  -> sigmoid(z) + eps              (variance)
    #   lanes [2n, ..) -> identity (value at lane 2n, zeros after)
    lane = jax.lax.broadcasted_iota(jnp.int32, (1, OUT_PAD), 1)
    is_policy = lane < n_actions                                   # (1, 128)
    is_var = jnp.logical_and(lane >= n_actions, lane < 2 * n_actions)

    s = jax.nn.sigmoid(jnp.where(is_policy, 2.0 * z, z))
    out_ref[...] = jnp.where(is_policy, 2.0 * s - 1.0,
                             jnp.where(is_var, s + eps, z))


# ---------------------------------------------------------------------------
# Parameter packing (per-head params -> fused / block-diagonal bf16 arrays)
# ---------------------------------------------------------------------------
def pack_ppo_params(params, state_dim, n_actions):
    heads = ("p", "s", "v")  # policy, var, value (order fixed everywhere)

    # Layer 1: concat along output dim -> [state_dim, 3*H1].
    w1_all = jnp.concatenate([params[f"{h}_w1"] for h in heads], axis=1)
    b1_all = jnp.concatenate([params[f"{h}_b1"] for h in heads], axis=1)

    # Layer 2: block-diagonal [3*H1, 3*H2] (no padding stripes).
    w2_bd = jnp.zeros((N_HEADS * H1, N_HEADS * H2), jnp.float32)
    b2_all = jnp.zeros((1, N_HEADS * H2), jnp.float32)
    for k, h in enumerate(heads):
        w2_bd = w2_bd.at[k * H1:(k + 1) * H1, k * H2:(k + 1) * H2].set(
            params[f"{h}_w2"])
        b2_all = b2_all.at[0, k * H2:(k + 1) * H2].set(params[f"{h}_b2"][0])

    # Layer 3: block-diagonal [3*H2, OUT_PAD] mapping into packed output lanes:
    #   policy -> cols [0, n), var -> cols [n, 2n), value -> col 2n.
    out_cols = {"p": (0, n_actions), "s": (n_actions, n_actions),
                "v": (2 * n_actions, 1)}
    w3_bd = jnp.zeros((N_HEADS * H2, OUT_PAD), jnp.float32)
    b3_all = jnp.zeros((1, OUT_PAD), jnp.float32)
    for k, h in enumerate(heads):
        off, width = out_cols[h]
        w3_bd = w3_bd.at[k * H2:(k + 1) * H2, off:off + width].set(
            params[f"{h}_w3"])
        b3_all = b3_all.at[0, off:off + width].set(params[f"{h}_b3"][0])

    # Weights in bf16 (MXU inputs), biases stay f32 (added to f32 accumulators).
    return (w1_all.astype(jnp.bfloat16), b1_all.astype(jnp.float32),
            w2_bd.astype(jnp.bfloat16), b2_all.astype(jnp.float32),
            w3_bd.astype(jnp.bfloat16), b3_all.astype(jnp.float32))


# ---------------------------------------------------------------------------
# Batch tiling heuristic
# ---------------------------------------------------------------------------
def _round_up(x, m):
    return ((x + m - 1) // m) * m


def _pick_batch_tile(B, max_tile=MAX_TILE):
    """Tile rows: multiple of 8, <= max_tile, aiming for an even grid >= 2
    (keeps both v7x TensorCores busy) without padding tiny batches much."""
    if B <= 16:
        return _round_up(max(B, 1), 8)
    target_steps = max(2, _round_up(-(-B // max_tile), 2))   # even, >= 2
    return min(max_tile, _round_up(-(-B // target_steps), 8))


# ---------------------------------------------------------------------------
# Wrapper
# ---------------------------------------------------------------------------
def ppo_agent_forward(observations, params, *, eps=1e-8, batch_tile=None):
    """observations: [B, state_dim]. params: per-head dict of weights/biases.

    Returns (policy_mean [B,n], var [B,n], value [B,1]) in float32.
    """
    B, state_dim = observations.shape
    n_actions = params["p_w3"].shape[1]
    assert 2 * n_actions + 1 <= OUT_PAD, "packed output exceeds 128 lanes"

    if batch_tile is None:
        batch_tile = _pick_batch_tile(B)
    batch_tile = _round_up(min(batch_tile, MAX_TILE), 8)

    # Pad the batch up to a tile multiple (padded rows are sliced off below).
    grid = -(-B // batch_tile)
    Bp = grid * batch_tile
    obs_in = observations
    if Bp != B:
        obs_in = jnp.pad(observations, ((0, Bp - B), (0, 0)))

    packed = pack_ppo_params(params, state_dim, n_actions)

    obs_spec = pl.BlockSpec((batch_tile, state_dim), lambda i: (i, 0))
    # Weights/biases are resident across the whole grid (constant index_map,
    # full-array block shapes -> legal even for the 192-lane fused blocks).
    param_specs = [pl.BlockSpec(p.shape, lambda i: (0, 0)) for p in packed]

    out_shape = jax.ShapeDtypeStruct((Bp, OUT_PAD), jnp.float32)
    out_spec = pl.BlockSpec((batch_tile, OUT_PAD), lambda i: (i, 0))

    # Advisory cost estimate so XLA schedules this small kernel sensibly.
    param_bytes = sum(int(p.size) * p.dtype.itemsize for p in packed)
    cost = pl.CostEstimate(
        flops=2 * Bp * (state_dim * N_HEADS * H1
                        + N_HEADS * H1 * N_HEADS * H2
                        + N_HEADS * H2 * OUT_PAD),
        transcendentals=Bp * OUT_PAD,   # single sigmoid pass per row
        bytes_accessed=(int(obs_in.size) * obs_in.dtype.itemsize
                        + param_bytes + Bp * OUT_PAD * 4),
    )

    kernel = functools.partial(_ppo_kernel, eps=eps, n_actions=n_actions)

    packed_out = pl.pallas_call(
        kernel,
        out_shape=out_shape,
        grid_spec=pltpu.PrefetchScalarGridSpec(
            num_scalar_prefetch=0,
            grid=(grid,),
            in_specs=[obs_spec] + param_specs,
            out_specs=out_spec,
        ),
        compiler_params=pltpu.CompilerParams(
            dimension_semantics=("parallel",),
            vmem_limit_bytes=32 * 1024 * 1024,  # comfortable on v5e/v6e/v7x
        ),
        cost_estimate=cost,
    )(obs_in, *packed)

    policy_mean = packed_out[:B, :n_actions]
    var = packed_out[:B, n_actions:2 * n_actions]
    value = packed_out[:B, 2 * n_actions:2 * n_actions + 1]
    return policy_mean, var, value


# ---------------------------------------------------------------------------
# Deterministic parameter initialization (orthogonal, gain=sqrt(2); zero bias)
# ---------------------------------------------------------------------------
def _orthogonal(key, out_features, in_features, gain):
    # Mirrors nn.init.orthogonal_ semantics on a [out, in] matrix, then
    # transposed to the kernel's [in, out] layout.
    rows, cols = out_features, in_features
    flat = jax.random.normal(key, (max(rows, cols), min(rows, cols)),
                             dtype=jnp.float32)
    q, r = jnp.linalg.qr(flat)
    q = q * jnp.sign(jnp.diagonal(r))[None, :]
    if rows < cols:
        q = q.T
    w = gain * q[:rows, :cols]           # [out, in]
    return w.T.astype(jnp.float32)       # [in, out]


def init_ppo_params(key, state_dim, n_actions):
    gain = 2.0 ** 0.5
    dims = [
        ("p", [(state_dim, 128), (128, 64), (64, n_actions)]),
        ("v", [(state_dim, 128), (128, 64), (64, 1)]),
        ("s", [(state_dim, 128), (128, 64), (64, n_actions)]),
    ]
    params = {}
    for head, layer_dims in dims:
        for li, (din, dout) in enumerate(layer_dims, start=1):
            key, sub = jax.random.split(key)
            params[f"{head}_w{li}"] = _orthogonal(sub, dout, din, gain)
            params[f"{head}_b{li}"] = jnp.zeros((1, dout), dtype=jnp.float32)
    return params


# ---------------------------------------------------------------------------
# Pure-JAX f32 reference for sanity check (per-head, unfused)
# ---------------------------------------------------------------------------
def _ref_forward(observations, params, eps=1e-8):
    def mlp(x, w1, b1, w2, b2, w3, b3):
        h1 = jnp.maximum(x @ params[w1] + params[b1], 0.0)
        h2 = jnp.maximum(h1 @ params[w2] + params[b2], 0.0)
        return h2 @ params[w3] + params[b3]

    x = observations
    mean = jnp.tanh(mlp(x, "p_w1", "p_b1", "p_w2", "p_b2", "p_w3", "p_b3"))
    var = jax.nn.sigmoid(
        mlp(x, "s_w1", "s_b1", "s_w2", "s_b2", "s_w3", "s_b3")) + eps
    value = mlp(x, "v_w1", "v_b1", "v_w2", "v_b2", "v_w3", "v_b3")
    return mean, var, value


if __name__ == "__main__":
    state_dim = 16
    n_actions = 4

    key = jax.random.PRNGKey(0)
    k_obs, k_params = jax.random.split(key)
    params = init_ppo_params(k_params, state_dim, n_actions)

    # bf16 matmuls -> loosen tolerances vs the f32 reference.
    TOL = dict(atol=5e-2, rtol=5e-2)

    # Primary small-batch check.
    batch = 8
    observations = jax.random.normal(k_obs, (batch, state_dim),
                                     dtype=jnp.float32)
    policy_mean, var, value = ppo_agent_forward(observations, params, eps=1e-8)
    jax.block_until_ready((policy_mean, var, value))

    ref_mean, ref_var, ref_value = _ref_forward(observations, params)
    assert policy_mean.shape == (batch, n_actions)
    assert var.shape == (batch, n_actions)
    assert value.shape == (batch, 1)
    assert jnp.allclose(policy_mean, ref_mean, **TOL)
    assert jnp.allclose(var, ref_var, **TOL)
    assert jnp.allclose(value, ref_value, **TOL)

    # Secondary check: batch not a multiple of 8 exercises the padding path.
    batch2 = 10
    obs2 = jax.random.normal(jax.random.PRNGKey(3), (batch2, state_dim),
                             dtype=jnp.float32)
    m2, v2, val2 = ppo_agent_forward(obs2, params, eps=1e-8)
    jax.block_until_ready((m2, v2, val2))
    rm2, rv2, rval2 = _ref_forward(obs2, params)
    assert m2.shape == (batch2, n_actions) and val2.shape == (batch2, 1)
    assert jnp.allclose(m2, rm2, **TOL)
    assert jnp.allclose(v2, rv2, **TOL)
    assert jnp.allclose(val2, rval2, **TOL)

    print("KERNEL_OK")
</pallas_src>

<mosaic_0001>
module attributes {stable_mosaic.version = 11 : i64} {
  func.func @_ppo_kernel(%arg0: i32, %arg1: memref<8x16xf32, #tpu.memory_space<vmem>>, %arg2: memref<16x384xbf16, #tpu.memory_space<vmem>>, %arg3: memref<1x384xf32, #tpu.memory_space<vmem>>, %arg4: memref<384x192xbf16, #tpu.memory_space<vmem>>, %arg5: memref<1x192xf32, #tpu.memory_space<vmem>>, %arg6: memref<192x128xbf16, #tpu.memory_space<vmem>>, %arg7: memref<1x128xf32, #tpu.memory_space<vmem>>, %arg8: memref<8x128xf32, #tpu.memory_space<vmem>>) attributes {dimension_semantics = [#tpu.dimension_semantics<parallel>], iteration_bounds = array<i64: 1>, scalar_prefetch = 0 : i64, scratch_operands = 0 : i64, tpu.core_type = #tpu.core_type<tc>, window_params = [{transform_indices = @transform_0, window_bounds = array<i64: 8, 16>}, {pipeline_mode = #tpu.pipeline_mode<synchronous>, transform_indices = @transform_1, window_bounds = array<i64: 16, 384>}, {pipeline_mode = #tpu.pipeline_mode<synchronous>, transform_indices = @transform_2, window_bounds = array<i64: 1, 384>}, {pipeline_mode = #tpu.pipeline_mode<synchronous>, transform_indices = @transform_3, window_bounds = array<i64: 384, 192>}, {pipeline_mode = #tpu.pipeline_mode<synchronous>, transform_indices = @transform_4, window_bounds = array<i64: 1, 192>}, {pipeline_mode = #tpu.pipeline_mode<synchronous>, transform_indices = @transform_5, window_bounds = array<i64: 192, 128>}, {pipeline_mode = #tpu.pipeline_mode<synchronous>, transform_indices = @transform_6, window_bounds = array<i64: 1, 128>}, {transform_indices = @transform_7, window_bounds = array<i64: 8, 128>}]} {
    %c0 = arith.constant 0 : index
    %c0_0 = arith.constant 0 : index
    %0 = vector.load %arg1[%c0, %c0_0] : memref<8x16xf32, #tpu.memory_space<vmem>>, vector<8x16xf32>
    %1 = arith.truncf %0 : vector<8x16xf32> to vector<8x16xbf16>
    %c0_1 = arith.constant 0 : index
    %c0_2 = arith.constant 0 : index
    %2 = vector.load %arg2[%c0_1, %c0_2] : memref<16x384xbf16, #tpu.memory_space<vmem>>, vector<16x384xbf16>
    %cst = arith.constant dense<0.000000e+00> : vector<8x384xf32>
    %3 = tpu.matmul %1, %2, %cst {dimension_numbers = #tpu.dot_dimension_numbers<[1], [0], [0], [1], [0, 0, 1, 1], [], []>} : vector<8x16xbf16>, vector<16x384xbf16>, vector<8x384xf32> -> vector<8x384xf32>
    %c0_3 = arith.constant 0 : index
    %c0_4 = arith.constant 0 : index
    %4 = vector.load %arg3[%c0_3, %c0_4] : memref<1x384xf32, #tpu.memory_space<vmem>>, vector<1x384xf32>
    %5 = vector.broadcast %4 : vector<1x384xf32> to vector<8x384xf32>
    %6 = arith.addf %3, %5 : vector<8x384xf32>
    %cst_5 = arith.constant 0.000000e+00 : f32
    %7 = vector.broadcast %cst_5 : f32 to vector<8x384xf32>
    %8 = arith.maximumf %6, %7 : vector<8x384xf32>
    %9 = arith.truncf %8 : vector<8x384xf32> to vector<8x384xbf16>
    %c0_6 = arith.constant 0 : index
    %c0_7 = arith.constant 0 : index
    %10 = vector.load %arg4[%c0_6, %c0_7] : memref<384x192xbf16, #tpu.memory_space<vmem>>, vector<384x192xbf16>
    %cst_8 = arith.constant dense<0.000000e+00> : vector<8x192xf32>
    %11 = tpu.matmul %9, %10, %cst_8 {dimension_numbers = #tpu.dot_dimension_numbers<[1], [0], [0], [1], [0, 0, 1, 1], [], []>} : vector<8x384xbf16>, vector<384x192xbf16>, vector<8x192xf32> -> vector<8x192xf32>
    %c0_9 = arith.constant 0 : index
    %c0_10 = arith.constant 0 : index
    %12 = vector.load %arg5[%c0_9, %c0_10] : memref<1x192xf32, #tpu.memory_space<vmem>>, vector<1x192xf32>
    %13 = vector.broadcast %12 : vector<1x192xf32> to vector<8x192xf32>
    %14 = arith.addf %11, %13 : vector<8x192xf32>
    %cst_11 = arith.constant 0.000000e+00 : f32
    %15 = vector.broadcast %cst_11 : f32 to vector<8x192xf32>
    %16 = arith.maximumf %14, %15 : vector<8x192xf32>
    %17 = arith.truncf %16 : vector<8x192xf32> to vector<8x192xbf16>
    %c0_12 = arith.constant 0 : index
    %c0_13 = arith.constant 0 : index
    %18 = vector.load %arg6[%c0_12, %c0_13] : memref<192x128xbf16, #tpu.memory_space<vmem>>, vector<192x128xbf16>
    %cst_14 = arith.constant dense<0.000000e+00> : vector<8x128xf32>
    %19 = tpu.matmul %17, %18, %cst_14 {dimension_numbers = #tpu.dot_dimension_numbers<[1], [0], [0], [1], [0, 0, 1, 1], [], []>} : vector<8x192xbf16>, vector<192x128xbf16>, vector<8x128xf32> -> vector<8x128xf32>
    %c0_15 = arith.constant 0 : index
    %c0_16 = arith.constant 0 : index
    %20 = vector.load %arg7[%c0_15, %c0_16] : memref<1x128xf32, #tpu.memory_space<vmem>>, vector<1x128xf32>
    %21 = vector.broadcast %20 : vector<1x128xf32> to vector<8x128xf32>
    %22 = arith.addf %19, %21 : vector<8x128xf32>
    %23 = tpu.iota {dimensions = array<i32: 1>} : vector<1x128xi32>
    %c4_i32 = arith.constant 4 : i32
    %24 = vector.broadcast %c4_i32 : i32 to vector<1x128xi32>
    %25 = arith.cmpi slt, %23, %24 : vector<1x128xi32>
    %c4_i32_17 = arith.constant 4 : i32
    %26 = vector.broadcast %c4_i32_17 : i32 to vector<1x128xi32>
    %27 = arith.cmpi sge, %23, %26 : vector<1x128xi32>
    %c8_i32 = arith.constant 8 : i32
    %28 = vector.broadcast %c8_i32 : i32 to vector<1x128xi32>
    %29 = arith.cmpi slt, %23, %28 : vector<1x128xi32>
    %30 = arith.andi %27, %29 : vector<1x128xi1>
    %cst_18 = arith.constant 2.000000e+00 : f32
    %31 = vector.broadcast %cst_18 : f32 to vector<8x128xf32>
    %32 = arith.mulf %31, %22 : vector<8x128xf32>
    %33 = vector.shape_cast %25 : vector<1x128xi1> to vector<1x128xi1>
    %34 = vector.broadcast %33 : vector<1x128xi1> to vector<8x128xi1>
    %35 = arith.select %34, %32, %22 : vector<8x128xi1>, vector<8x128xf32>
    %36 = arith.negf %35 : vector<8x128xf32>
    %37 = math.exp %36 : vector<8x128xf32>
    %cst_19 = arith.constant 1.000000e+00 : f32
    %38 = vector.broadcast %cst_19 : f32 to vector<8x128xf32>
    %39 = arith.addf %38, %37 : vector<8x128xf32>
    %40 = arith.divf %38, %39 : vector<8x128xf32>
    %cst_20 = arith.constant 2.000000e+00 : f32
    %41 = vector.broadcast %cst_20 : f32 to vector<8x128xf32>
    %42 = arith.mulf %41, %40 : vector<8x128xf32>
    %cst_21 = arith.constant 1.000000e+00 : f32
    %43 = vector.broadcast %cst_21 : f32 to vector<8x128xf32>
    %44 = arith.subf %42, %43 : vector<8x128xf32>
    %cst_22 = arith.constant 9.99999993E-9 : f32
    %45 = vector.broadcast %cst_22 : f32 to vector<8x128xf32>
    %46 = arith.addf %40, %45 : vector<8x128xf32>
    %47 = vector.shape_cast %30 : vector<1x128xi1> to vector<1x128xi1>
    %48 = vector.broadcast %47 : vector<1x128xi1> to vector<8x128xi1>
    %49 = arith.select %48, %46, %22 : vector<8x128xi1>, vector<8x128xf32>
    %50 = vector.shape_cast %25 : vector<1x128xi1> to vector<1x128xi1>
    %51 = vector.broadcast %50 : vector<1x128xi1> to vector<8x128xi1>
    %52 = arith.select %51, %44, %49 : vector<8x128xi1>, vector<8x128xf32>
    %c0_23 = arith.constant 0 : index
    %c0_24 = arith.constant 0 : index
    %53 = vector.load %arg8[%c0_23, %c0_24] : memref<8x128xf32, #tpu.memory_space<vmem>>, vector<8x128xf32>
    tpu.vector_store %arg8[%c0_23, %c0_24], %52 {strides = array<i32>} : memref<8x128xf32, #tpu.memory_space<vmem>>, vector<8x128xf32>,
    return
  }
  func.func @transform_0(%arg0: i32) -> (i32, i32) {
    %c0_i32 = arith.constant 0 : i32
    %c0_i32_0 = arith.constant 0 : i32
    return %arg0, %c0_i32 : i32, i32
  }
  func.func @transform_1(%arg0: i32) -> (i32, i32) {
    %c0_i32 = arith.constant 0 : i32
    %c0_i32_0 = arith.constant 0 : i32
    %c0_i32_1 = arith.constant 0 : i32
    return %c0_i32, %c0_i32_0 : i32, i32
  }
  func.func @transform_2(%arg0: i32) -> (i32, i32) {
    %c0_i32 = arith.constant 0 : i32
    %c0_i32_0 = arith.constant 0 : i32
    %c0_i32_1 = arith.constant 0 : i32
    return %c0_i32, %c0_i32_0 : i32, i32
  }
  func.func @transform_3(%arg0: i32) -> (i32, i32) {
    %c0_i32 = arith.constant 0 : i32
    %c0_i32_0 = arith.constant 0 : i32
    %c0_i32_1 = arith.constant 0 : i32
    return %c0_i32, %c0_i32_0 : i32, i32
  }
  func.func @transform_4(%arg0: i32) -> (i32, i32) {
    %c0_i32 = arith.constant 0 : i32
    %c0_i32_0 = arith.constant 0 : i32
    %c0_i32_1 = arith.constant 0 : i32
    return %c0_i32, %c0_i32_0 : i32, i32
  }
  func.func @transform_5(%arg0: i32) -> (i32, i32) {
    %c0_i32 = arith.constant 0 : i32
    %c0_i32_0 = arith.constant 0 : i32
    %c0_i32_1 = arith.constant 0 : i32
    return %c0_i32, %c0_i32_0 : i32, i32
  }
  func.func @transform_6(%arg0: i32) -> (i32, i32) {
    %c0_i32 = arith.constant 0 : i32
    %c0_i32_0 = arith.constant 0 : i32
    %c0_i32_1 = arith.constant 0 : i32
    return %c0_i32, %c0_i32_0 : i32, i32
  }
  func.func @transform_7(%arg0: i32) -> (i32, i32) {
    %c0_i32 = arith.constant 0 : i32
    %c0_i32_0 = arith.constant 0 : i32
    return %arg0, %c0_i32 : i32, i32
  }
}

</mosaic_0001>

<bundles_post_ra>
// kernel: tpu_custom_call.1
= control target key start
LH: loop header
LB: loop body
LE: loop exit
PB: predicated region body
PF: predicated region fallthrough
CT: control target
= control target key end

     0   :  { %vm58_vm0 = vcmask 130048   ;;  %s1422_s0 = inlined_call_operand.vmem [shape: f32[8,16], index: 0, kind: input, shape index: {}]   ;;  %s1423_s1 = inlined_call_operand.vmem [shape: bf16[16,384], index: 1, kind: input, shape index: {}]   ;;  %s1424_s2 = inlined_call_operand.vmem [shape: f32[1,384], index: 2, kind: input, shape index: {}]   ;;  %s1425_s3 = inlined_call_operand.vmem [shape: bf16[384,192], index: 3, kind: input, shape index: {}]   ;;  %s1426_s4 = inlined_call_operand.vmem [shape: f32[1,192], index: 4, kind: input, shape index: {}]   ;;  %s1427_s5 = inlined_call_operand.vmem [shape: bf16[192,128], index: 5, kind: input, shape index: {}]   ;;  %s1428_s6 = inlined_call_operand.vmem [shape: f32[1,128], index: 6, kind: input, shape index: {}]   ;;  %s1429_s7 = inlined_call_operand.hbm [shape: f32[8,128], index: 7, kind: output, shape index: {}]  }
   0x1   :  { %v668_v0 = vld [vmem:[%s1423_s1] sm:$0xf]  ;;  %v925_v1 = vld [vmem:[%s1423_s1 + $0x8] sm:$0xf0]  ;;  %v924_v2 = vld [vmem:[%s1423_s1 + $0x4] sm:$0xf] }
   0x2   :  { %v669_v3 = vor.u32 %v925_v1, %v668_v0  ;;  %v670_v4 = vld [vmem:[%s1423_s1 + $0xc] sm:$0xf0]  ;;  %v28_v5 = vld [vmem:[%s1422_s0] sm:$0xff]  ;;  %v676_v6 = vld [vmem:[%s1423_s1 + $0x8] sm:$0xf] }
   0x3   :  { %v673_v7 = vor.u32 %v924_v2, %v670_v4  ;;  %v29_v8 = vpack.c.bf16 %v28_v5, %v28_v5  ;;  %v926_v9 = vld [vmem:[%s1423_s1 + $0x10] sm:$0xf0]  ;;  %v739_v10 = vld [vmem:[%s1425_s3 + $0x70] sm:$0xf]  ;;  %v942_v11 = vld [vmem:[%s1425_s3 + $0x74] sm:$0xf0] }
   0x4   :  { %69 = vmatpush.bf16.msra.mxu0 %v669_v3  ;;  %v677_v12 = vor.u32 %v926_v9, %v676_v6  ;;  %v740_v13 = vor.u32 %v942_v11, %v739_v10  ;;  %v803_v14 = vld [vmem:[%s1425_s3 + $0xf0] sm:$0xf]  ;;  %v958_v15 = vld [vmem:[%s1425_s3 + $0xf4] sm:$0xf0]  ;;  %v731_v16 = vld [vmem:[%s1425_s3 + $0x60] sm:$0xf] }
   0x5   :  { %82 = vmatpush.bf16.msra.mxu1 %v673_v7  ;;  %v804_v17 = vor.u32 %v958_v15, %v803_v14  ;;  %v940_v18 = vld [vmem:[%s1425_s3 + $0x64] sm:$0xf0]  ;;  %v795_v19 = vld [vmem:[%s1425_s3 + $0xe0] sm:$0xf]  ;;  %v723_v22 = vld [vmem:[%s1425_s3 + $0x50] sm:$0xf] }
   0x6   :  { %v956_v20 = vld [vmem:[%s1425_s3 + $0xe4] sm:$0xf0]  ;;  %95 = vmatpush.bf16.msra.mxu2 %v677_v12  ;;  %401 = vmatpush.bf16.msra.mxu3 %v740_v13  ;;  %v732_v21 = vor.u32 %v940_v18, %v731_v16  ;;  %v938_v23 = vld [vmem:[%s1425_s3 + $0x54] sm:$0xf0]  ;;  %v941_v25 = vld [vmem:[%s1425_s3 + $0x74] sm:$0xf] }
   0x7   :  { %678 = vmatmul.msk.bf16.vlgmr.msra.gmra.mxu0 %vm58_vm0, %v29_v8  ;;  %v796_v24 = vor.u32 %v956_v20, %v795_v19  ;;  %v787_v26 = vld [vmem:[%s1425_s3 + $0xd0] sm:$0xf]  ;;  %v954_v27 = vld [vmem:[%s1425_s3 + $0xd4] sm:$0xf0]  ;;  %v741_v28 = vld [vmem:[%s1425_s3 + $0x78] sm:$0xf0]  ;;  %v724_v29 = vor.u32 %v938_v23, %v723_v22 }
   0x8   :  { %679 = vmatmul.msk.bf16.vlgmr.msra.gmra.mxu1 %vm58_vm0, %v29_v8  ;;  %414 = vmatpush.bf16.msrb.mxu0 %v804_v17  ;;  %v744_v30 = vor.u32 %v941_v25, %v741_v28  ;;  %v939_v31 = vld [vmem:[%s1425_s3 + $0x64] sm:$0xf]  ;;  %v715_v32 = vld [vmem:[%s1425_s3 + $0x40] sm:$0xf]  ;;  %v936_v33 = vld [vmem:[%s1425_s3 + $0x44] sm:$0xf0]  ;;  %v788_v35 = vor.u32 %v954_v27, %v787_v26 }
   0x9   :  { %680 = vmatmul.msk.bf16.vlgmr.msra.gmra.mxu2 %vm58_vm0, %v29_v8  ;;  %v733_v34 = vld [vmem:[%s1425_s3 + $0x68] sm:$0xf0]  ;;  %v779_v36 = vld [vmem:[%s1425_s3 + $0xc0] sm:$0xf]  ;;  %v952_v37 = vld [vmem:[%s1425_s3 + $0xc4] sm:$0xf0]  ;;  %v716_v43 = vor.u32 %v936_v33, %v715_v32 }
   0xa   :  { %402 = vmatpush.bf16.msra.mxu3 %v732_v21  ;;  %440 = vmatpush.bf16.msrb.mxu2 %v744_v30  ;;  %v736_v38 = vor.u32 %v939_v31, %v733_v34  ;;  %v937_v39 = vld [vmem:[%s1425_s3 + $0x54] sm:$0xf]  ;;  %v725_v40 = vld [vmem:[%s1425_s3 + $0x58] sm:$0xf0]  ;;  %v867_v41 = vld [vmem:[%s1425_s3 + $0x170] sm:$0xf]  ;;  %v780_v47 = vor.u32 %v952_v37, %v779_v36 }
   0xb   :  { %v974_v42 = vld [vmem:[%s1425_s3 + $0x174] sm:$0xf0]  ;;  %v707_v45 = vld [vmem:[%s1425_s3 + $0x30] sm:$0xf]  ;;  %v728_v49 = vor.u32 %v937_v39, %v725_v40  ;;  %v859_v50 = vld [vmem:[%s1425_s3 + $0x160] sm:$0xf] }
   0xc   :  { %415 = vmatpush.bf16.msrb.mxu0 %v796_v24  ;;  %v868_v44 = vor.u32 %v974_v42, %v867_v41  ;;  %v934_v46 = vld [vmem:[%s1425_s3 + $0x34] sm:$0xf0]  ;;  %v771_v48 = vld [vmem:[%s1425_s3 + $0xb0] sm:$0xf]  ;;  %v972_v51 = vld [vmem:[%s1425_s3 + $0x164] sm:$0xf0] }
   0xd   :  { %v950_v52 = vld [vmem:[%s1425_s3 + $0xb4] sm:$0xf0]  ;;  %v935_v53 = vld [vmem:[%s1425_s3 + $0x44] sm:$0xf]  ;;  %v717_v54 = vld [vmem:[%s1425_s3 + $0x48] sm:$0xf0]  ;;  %v860_v55 = vor.u32 %v972_v51, %v859_v50  ;;  %v708_v56 = vor.u32 %v934_v46, %v707_v45 }
   0xe   :  { %403 = vmatpush.bf16.msra.mxu3 %v724_v29  ;;  %441 = vmatpush.bf16.msrb.mxu2 %v736_v38  ;;  %v699_v57 = vld [vmem:[%s1425_s3 + $0x20] sm:$0xf]  ;;  %v932_v58 = vld [vmem:[%s1425_s3 + $0x24] sm:$0xf0]  ;;  %v772_v59 = vor.u32 %v950_v52, %v771_v48  ;;  %v720_v61 = vor.u32 %v935_v53, %v717_v54  ;;  %v851_v62 = vld [vmem:[%s1425_s3 + $0x150] sm:$0xf] }
   0xf   :  { %427 = vmatpush.bf16.msrb.mxu1 %v868_v44  ;;  %v763_v60 = vld [vmem:[%s1425_s3 + $0xa0] sm:$0xf]  ;;  %v970_v63 = vld [vmem:[%s1425_s3 + $0x154] sm:$0xf0]  ;;  %v948_v0 = vld [vmem:[%s1425_s3 + $0xa4] sm:$0xf0]  ;;  %v700_v4 = vor.u32 %v932_v58, %v699_v57 }
  0x10   :  { %416 = vmatpush.bf16.msrb.mxu0 %v788_v35  ;;  %v933_v1 = vld [vmem:[%s1425_s3 + $0x34] sm:$0xf]  ;;  %v709_v2 = vld [vmem:[%s1425_s3 + $0x38] sm:$0xf0]  ;;  %v852_v3 = vor.u32 %v970_v63, %v851_v62  ;;  %v691_v5 = vld [vmem:[%s1425_s3 + $0x10] sm:$0xf]  ;;  %v764_v9 = vor.u32 %v948_v0, %v763_v60 }
  0x11   :  { %v843_v6 = vld [vmem:[%s1425_s3 + $0x140] sm:$0xf]  ;;  %v930_v7 = vld [vmem:[%s1425_s3 + $0x14] sm:$0xf0]  ;;  %v968_v8 = vld [vmem:[%s1425_s3 + $0x144] sm:$0xf0]  ;;  %v712_v11 = vor.u32 %v933_v1, %v709_v2 }
  0x12   :  { %404 = vmatpush.bf16.msra.mxu3 %v716_v43  ;;  %442 = vmatpush.bf16.msrb.mxu2 %v728_v49  ;;  %v755_v10 = vld [vmem:[%s1425_s3 + $0x90] sm:$0xf] }
  0x13   :  { %428 = vmatpush.bf16.msrb.mxu1 %v860_v55 }
  0x14   :  { %417 = vmatpush.bf16.msrb.mxu0 %v780_v47 }
  0x16   :  { %405 = vmatpush.bf16.msra.mxu3 %v708_v56  ;;  %443 = vmatpush.bf16.msrb.mxu2 %v720_v61 }
  0x18   :  { %418 = vmatpush.bf16.msrb.mxu0 %v772_v59 }
  0x19   :  { %12 = vsyncpa [#allocation3], 0  ;;  %v946_v12 = vld [vmem:[%s1425_s3 + $0x94] sm:$0xf0]  ;;  %429 = vmatpush.bf16.msrb.mxu1 %v852_v3  ;;  %v931_v13 = vld [vmem:[%s1425_s3 + $0x24] sm:$0xf]  ;;  %v844_v15 = vor.u32 %v968_v8, %v843_v6  ;;  %v692_v16 = vor.u32 %v930_v7, %v691_v5 }
  0x1a   :  { %v701_v14 = vld [vmem:[%s1425_s3 + $0x28] sm:$0xf0]  ;;  %406 = vmatpush.bf16.msra.mxu3 %v700_v4  ;;  %v683_v17 = vld [vmem:[%s1425_s3] sm:$0xf]  ;;  %v928_v18 = vld [vmem:[%s1425_s3 + $0x4] sm:$0xf0]  ;;  %v756_v19 = vor.u32 %v946_v12, %v755_v10  ;;  %444 = vmatpush.bf16.msrb.mxu2 %v712_v11 }
  0x1b   :  { %v957_v20 = vld [vmem:[%s1425_s3 + $0xf4] sm:$0xf]  ;;  %v805_v21 = vld [vmem:[%s1425_s3 + $0xf8] sm:$0xf0]  ;;  %v704_v22 = vor.u32 %v931_v13, %v701_v14  ;;  %v747_v23 = vld [vmem:[%s1425_s3 + $0x80] sm:$0xf]  ;;  %v684_v25 = vor.u32 %v928_v18, %v683_v17 }
  0x1c   :  { %419 = vmatpush.bf16.msrb.mxu0 %v764_v9  ;;  %v944_v24 = vld [vmem:[%s1425_s3 + $0x84] sm:$0xf0]  ;;  %v973_v26 = vld [vmem:[%s1425_s3 + $0x174] sm:$0xf]  ;;  %v869_v27 = vld [vmem:[%s1425_s3 + $0x178] sm:$0xf0]  ;;  %v808_v28 = vor.u32 %v957_v20, %v805_v21 }
  0x1d   :  { %430 = vmatpush.bf16.msrb.mxu1 %v844_v15  ;;  %v748_v29 = vor.u32 %v944_v24, %v747_v23  ;;  %v955_v30 = vld [vmem:[%s1425_s3 + $0xe4] sm:$0xf]  ;;  %v797_v31 = vld [vmem:[%s1425_s3 + $0xe8] sm:$0xf0]  ;;  %v872_v32 = vor.u32 %v973_v26, %v869_v27  ;;  %v929_v37 = vld [vmem:[%s1425_s3 + $0x14] sm:$0xf] }
  0x1e   :  { %407 = vmatpush.bf16.msra.mxu3 %v692_v16  ;;  %445 = vmatpush.bf16.msrb.mxu2 %v704_v22  ;;  %v971_v33 = vld [vmem:[%s1425_s3 + $0x164] sm:$0xf]  ;;  %v861_v34 = vld [vmem:[%s1425_s3 + $0x168] sm:$0xf0]  ;;  %v800_v35 = vor.u32 %v955_v30, %v797_v31  ;;  %v693_v38 = vld [vmem:[%s1425_s3 + $0x18] sm:$0xf0] }
  0x1f   :  { %v864_v36 = vor.u32 %v971_v33, %v861_v34  ;;  %v953_v39 = vld [vmem:[%s1425_s3 + $0xd4] sm:$0xf]  ;;  %v696_v40 = vor.u32 %v929_v37, %v693_v38  ;;  %v789_v41 = vld [vmem:[%s1425_s3 + $0xd8] sm:$0xf0]  ;;  %v835_v46 = vld [vmem:[%s1425_s3 + $0x130] sm:$0xf] }
  0x20   :  { %420 = vmatpush.bf16.msrb.mxu0 %v756_v19  ;;  %v969_v42 = vld [vmem:[%s1425_s3 + $0x154] sm:$0xf]  ;;  %v853_v43 = vld [vmem:[%s1425_s3 + $0x158] sm:$0xf0]  ;;  %v792_v44 = vor.u32 %v953_v39, %v789_v41  ;;  %v966_v47 = vld [vmem:[%s1425_s3 + $0x134] sm:$0xf0] }
  0x21   :  { %v856_v45 = vor.u32 %v969_v42, %v853_v43  ;;  %v836_v48 = vor.u32 %v966_v47, %v835_v46  ;;  %v927_v49 = vld [vmem:[%s1425_s3 + $0x4] sm:$0xf]  ;;  %v685_v50 = vld [vmem:[%s1425_s3 + $0x8] sm:$0xf0]  ;;  %v827_v58 = vld [vmem:[%s1425_s3 + $0x120] sm:$0xf] }
  0x22   :  { %408 = vmatpush.bf16.msra.mxu3 %v684_v25  ;;  %446 = vmatpush.bf16.msrb.mxu2 %v696_v40  ;;  %v951_v51 = vld [vmem:[%s1425_s3 + $0xc4] sm:$0xf]  ;;  %v688_v52 = vor.u32 %v927_v49, %v685_v50  ;;  %v781_v53 = vld [vmem:[%s1425_s3 + $0xc8] sm:$0xf0]  ;;  %v964_v59 = vld [vmem:[%s1425_s3 + $0x124] sm:$0xf0] }
  0x23   :  { %431 = vmatpush.bf16.msrb.mxu1 %v836_v48  ;;  %v967_v54 = vld [vmem:[%s1425_s3 + $0x144] sm:$0xf]  ;;  %v845_v55 = vld [vmem:[%s1425_s3 + $0x148] sm:$0xf0]  ;;  %v784_v56 = vor.u32 %v951_v51, %v781_v53  ;;  %v828_v60 = vor.u32 %v964_v59, %v827_v58  ;;  %v949_v61 = vld [vmem:[%s1425_s3 + $0xb4] sm:$0xf] }
  0x24   :  { %421 = vmatpush.bf16.msrb.mxu0 %v748_v29  ;;  %v848_v57 = vor.u32 %v967_v54, %v845_v55  ;;  %v773_v62 = vld [vmem:[%s1425_s3 + $0xb8] sm:$0xf0]  ;;  %v965_v63 = vld [vmem:[%s1425_s3 + $0x134] sm:$0xf]  ;;  %v819_v3 = vld [vmem:[%s1425_s3 + $0x110] sm:$0xf] }
  0x25   :  { %v776_v0 = vor.u32 %v949_v61, %v773_v62  ;;  %v837_v1 = vld [vmem:[%s1425_s3 + $0x138] sm:$0xf0]  ;;  %v962_v4 = vld [vmem:[%s1425_s3 + $0x114] sm:$0xf0]  ;;  %v947_v6 = vld [vmem:[%s1425_s3 + $0xa4] sm:$0xf] }
  0x26   :  { %453 = vmatpush.bf16.msrb.mxu3 %v808_v28  ;;  %447 = vmatpush.bf16.msrb.mxu2 %v688_v52  ;;  %v840_v2 = vor.u32 %v965_v63, %v837_v1  ;;  %v820_v5 = vor.u32 %v962_v4, %v819_v3  ;;  %v765_v7 = vld [vmem:[%s1425_s3 + $0xa8] sm:$0xf0]  ;;  %v963_v8 = vld [vmem:[%s1425_s3 + $0x124] sm:$0xf]  ;;  %v811_v12 = vld [vmem:[%s1425_s3 + $0x100] sm:$0xf] }
  0x27   :  { %432 = vmatpush.bf16.msrb.mxu1 %v828_v60  ;;  %v768_v9 = vor.u32 %v947_v6, %v765_v7  ;;  %v829_v10 = vld [vmem:[%s1425_s3 + $0x128] sm:$0xf0]  ;;  %v960_v13 = vld [vmem:[%s1425_s3 + $0x104] sm:$0xf0]  ;;  %v945_v15 = vld [vmem:[%s1425_s3 + $0x94] sm:$0xf] }
  0x28   :  { %466 = vmatpush.bf16.msra.mxu0 %v872_v32  ;;  %v832_v11 = vor.u32 %v963_v8, %v829_v10  ;;  %v812_v14 = vor.u32 %v960_v13, %v811_v12  ;;  %v757_v16 = vld [vmem:[%s1425_s3 + $0x98] sm:$0xf0]  ;;  %v961_v17 = vld [vmem:[%s1425_s3 + $0x114] sm:$0xf]  ;;  %v943_v21 = vld [vmem:[%s1425_s3 + $0x84] sm:$0xf] }
  0x29   :  { %v760_v18 = vor.u32 %v945_v15, %v757_v16  ;;  %v821_v19 = vld [vmem:[%s1425_s3 + $0x118] sm:$0xf0]  ;;  %v749_v22 = vld [vmem:[%s1425_s3 + $0x88] sm:$0xf0]  ;;  %v959_v23 = vld [vmem:[%s1425_s3 + $0x104] sm:$0xf] }
  0x2a   :  { %454 = vmatpush.bf16.msrb.mxu3 %v800_v35  ;;  %v824_v20 = vor.u32 %v961_v17, %v821_v19  ;;  %v813_v24 = vld [vmem:[%s1425_s3 + $0x108] sm:$0xf0]  ;;  %v752_v25 = vor.u32 %v943_v21, %v749_v22  ;;  %v982_v27 = vld [vmem:[%s1427_s5 + $0x38] sm:$0xff]  ;;  %v34_v28 = vld [vmem:[%s1424_s2] sm:$0x7]  ;;  %vm583_vm1 = vcmask 523264   ;;  %v613_v21 = vlaneseq }
  0x2b   :  { %433 = vmatpush.bf16.msrb.mxu1 %v820_v5  ;;  %v816_v26 = vor.u32 %v959_v23, %v813_v24  ;;  %v981_v29 = vld [vmem:[%s1427_s5 + $0x30] sm:$0xff]  ;;  %v36_v30 = vperm.slane %v34_v28, 0  ;;  %v37_v31 = vperm.slane %v34_v28, 1  ;;  %v980_v32 = vld [vmem:[%s1427_s5 + $0x28] sm:$0xff]  ;;  %v979_v37 = vld [vmem:[%s1427_s5 + $0x20] sm:$0xff]  ;;  %v38_v41 = vperm.slane %v34_v28, 2 }
  0x2c   :  { %467 = vmatpush.bf16.msra.mxu0 %v864_v36  ;;  %v978_v50 = vld [vmem:[%s1427_s5 + $0x18] sm:$0xff]  ;;  %v977_v51 = vld [vmem:[%s1427_s5 + $0x10] sm:$0xff]  ;;  %v976_v52 = vld [vmem:[%s1427_s5 + $0x8] sm:$0xff]  ;;  %v614_v23 = vand.u32 127, %v613_v21  ;;  %s657_s11 = sshll.u32 %s1429_s7, 4  ;;  %s658_s11 = int_to_ptr.hbm [resolvable:$true] %s657_s11 }
  0x2d   :  { %v975_v53 = vld [vmem:[%s1427_s5] sm:$0xff]  ;;  %v986_v54 = vld [vmem:[%s1427_s5 + $0x58] sm:$0xff]  ;;  %v985_v55 = vld [vmem:[%s1427_s5 + $0x50] sm:$0xff] }
  0x2e   :  { %455 = vmatpush.bf16.msrb.mxu3 %v792_v44  ;;  %604 = vmatpush.bf16.msra.mxu2 %v986_v54  ;;  %v155_v58 = vld [vmem:[%s1426_s4] sm:$0x3]  ;;  %vm615_vm2 = vcmp.lt.s32.totalorder %v614_v23, 4  ;;  %vm616_vm4 = vcmp.ge.s32.totalorder %v614_v23, 4  ;;  %vm617_vm5 = vcmp.lt.s32.totalorder %v614_v23, 8 }
  0x2f   :  { %434 = vmatpush.bf16.msrb.mxu1 %v812_v14  ;;  %v157_v60 = vperm.slane %v155_v58, 0  ;;  %v988_v22 = vld [vmem:[%s1428_s6] ss:$0 sm:$0xff]  ;;  %vm618_vm9 = vmand %vm616_vm4, %vm617_vm5  ;;  %s1019_s6 = smov [#allocation2]  }
  0x30   :  { %468 = vmatpush.bf16.msra.mxu0 %v856_v45  ;;  %s655_s8 = sshll.u32 %s1019_s6, 4  ;;  %s656_s8 = int_to_ptr.vmem [resolvable:$true] %s655_s8 }
  0x32   :  { %456 = vmatpush.bf16.msrb.mxu3 %v784_v56  ;;  %605 = vmatpush.bf16.msra.mxu2 %v985_v55  ;;  %v984_v56 = vld [vmem:[%s1427_s5 + $0x48] sm:$0xff] }
  0x33   :  { %587 = vmatpush.bf16.msra.mxu1 %v982_v27 }
  0x34   :  { %469 = vmatpush.bf16.msra.mxu0 %v848_v57  ;;  %v983_v57 = vld [vmem:[%s1427_s5 + $0x40] sm:$0xff] }
  0x36   :  { %457 = vmatpush.bf16.msrb.mxu3 %v776_v0  ;;  %606 = vmatpush.bf16.msra.mxu2 %v984_v56 }
  0x37   :  { %588 = vmatpush.bf16.msra.mxu1 %v981_v29 }
  0x38   :  { %470 = vmatpush.bf16.msra.mxu0 %v840_v2 }
  0x3a   :  { %458 = vmatpush.bf16.msrb.mxu3 %v768_v9  ;;  %607 = vmatpush.bf16.msra.mxu2 %v983_v57  ;;  %v158_v9 = vperm.slane %v155_v58, 1 }
  0x3b   :  { %589 = vmatpush.bf16.msra.mxu1 %v980_v32 }
  0x3c   :  { %471 = vmatpush.bf16.msra.mxu0 %v832_v11 }
  0x3e   :  { %459 = vmatpush.bf16.msrb.mxu3 %v760_v18 }
  0x3f   :  { %590 = vmatpush.bf16.msra.mxu1 %v979_v37 }
  0x40   :  { %472 = vmatpush.bf16.msra.mxu0 %v824_v20 }
  0x42   :  { %460 = vmatpush.bf16.msrb.mxu3 %v752_v25 }
  0x43   :  { %591 = vmatpush.bf16.msra.mxu1 %v978_v50 }
  0x44   :  { %473 = vmatpush.bf16.msra.mxu0 %v816_v26 }
  0x47   :  { %592 = vmatpush.bf16.msra.mxu1 %v977_v51 }
  0x4b   :  { %593 = vmatpush.bf16.msra.mxu1 %v976_v52 }
  0x4f   :  { %594 = vmatpush.bf16.msra.mxu1 %v975_v53 }
  0x84   :  { %v71_v33 = vpop.f32.mrf.mxu0 }
  0x85   :  { %v72_v34 = vadd.f32 %v71_v33, %v36_v30  ;;  %v84_v35 = vpop.f32.mrf.mxu1 }
  0x86   :  { %v85_v36 = vadd.f32 %v84_v35, %v37_v31 }
  0x87   :  { %v101_v38 = vmax.f32 %v72_v34, 0.0 }
  0x88   :  { %v102_v39 = vmax.f32 %v85_v36, 0.0 }
  0x89   :  { %v104_v40 = vpack.c.bf16 %v101_v38, %v101_v38 }
  0x8a   :  { %v105_v42 = vpack.c.bf16 %v102_v39, %v102_v39 }
  0x8b   :  { %409 = vmatmul.bf16.vlgmr.msra.gmra.mxu3 %v104_v40  ;;  %448 = vmatmul.bf16.vlgmr.msrb.gmra.mxu2 %v104_v40 }
  0x8c   :  { %422 = vmatmul.bf16.vlgmr.msrb.gmra.mxu0 %v105_v42  ;;  %v73_v43 = vpop.f32.mrf.mxu0  ;;  %v97_v44 = vpop.f32.mrf.mxu2 }
  0x8d   :  { %v86_v45 = vpop.f32.mrf.mxu1  ;;  %v98_v46 = vadd.f32 %v97_v44, %v38_v41 }
  0x8f   :  { %v103_v47 = vmax.f32 %v98_v46, 0.0 }
  0x91   :  { %v106_v48 = vpack.c.bf16 %v103_v47, %v103_v47 }
  0x93   :  { %435 = vmatmul.bf16.vlgmr.msrb.gmra.mxu1 %v106_v48 }
  0x94   :  { %v99_v49 = vpop.f32.mrf.mxu2 }
  0x9b   :  { %461 = vmatmul.bf16.vlgmr.msrb.gmra.mxu3 %v105_v42 }
  0x9c   :  { %474 = vmatmul.bf16.vlgmr.msra.gmra.mxu0 %v106_v48 }
 0x109   :  { %v423_v59 = vpop.f32.mrf.mxu0 }
 0x10e   :  { %v410_v61 = vpop.f32.mrf.mxu3  ;;  %v449_v62 = vpop.f32.mrf.mxu2 }
 0x10f   :  { %v411_v63 = vadd.f32 %v410_v61, %v157_v60  ;;  %v450_v11 = vadd.f32 %v449_v62, %v158_v9 }
 0x110   :  { %v436_v0 = vpop.f32.mrf.mxu1 }
 0x111   :  { %v425_v1 = vpop.f32.mrf.mxu0  ;;  %v424_v2 = vadd.f32 %v423_v59, %v411_v63 }
 0x113   :  { %v437_v3 = vadd.f32 %v436_v0, %v424_v2 }
 0x115   :  { %v479_v4 = vmax.f32 %v437_v3, 0.0 }
 0x116   :  { %v412_v5 = vpop.f32.mrf.mxu3  ;;  %v451_v6 = vpop.f32.mrf.mxu2 }
 0x117   :  { %v481_v7 = vpack.c.bf16 %v479_v4, %v479_v4 }
 0x118   :  { %v438_v8 = vpop.f32.mrf.mxu1 }
 0x119   :  { %v475_v10 = vpop.f32.mrf.mxu0  ;;  %595 = vmatmul.bf16.vlgmr.msra.gmra.mxu1 %v481_v7 }
 0x11e   :  { %v462_v12 = vpop.f32.mrf.mxu3 }
 0x11f   :  { %v463_v13 = vadd.f32 %v462_v12, %v450_v11 }
 0x121   :  { %v476_v14 = vadd.f32 %v475_v10, %v463_v13  ;;  %v477_v15 = vpop.f32.mrf.mxu0 }
 0x123   :  { %v480_v16 = vmax.f32 %v476_v14, 0.0 }
 0x125   :  { %v482_v17 = vpack.c.bf16 %v480_v16, %v480_v16 }
 0x126   :  { %v464_v18 = vpop.f32.mrf.mxu3 }
 0x127   :  { %921 = vmatmul.msk.bf16.vlgmr.msra.gmra.mxu2 %vm583_vm1, %v482_v17 }
 0x196   :  { %v596_v19 = vpop.f32.mrf.mxu1 }
 0x197   :  { %v597_v24 = vadd.f32 %v988_v22, %v596_v19 }
 0x19e   :  { %v598_v20 = vpop.f32.mrf.mxu1 }
 0x1aa   :  { %v609_v25 = vpop.f32.mrf.mxu2 }
 0x1ab   :  { %v610_v26 = vadd.f32 %v609_v25, %v597_v24 }
 0x1ad   :  { %v619_v27 = vmul.f32 2.0, %v610_v26 }
 0x1af   :  { %v622_v28 = vsel %vm615_vm2, %v619_v27, %v610_v26 }
 0x1b0   :  { %v922_v29 = vmul.f32 -1.442695, %v622_v28 }
 0x1b2   :  { %989 = vpow2.f32 %v922_v29  ;;  %v611_v30 = vpop.f32.mrf.mxu2 }
 0x1b8   :  { %v990_v31 = vpop.eup %989 }
 0x1b9   :  { %v626_v32 = vadd.f32 1.0, %v990_v31 }
 0x1bb   :  { %991 = vrcp.f32 %v626_v32  ;;  %v638_v36 = vand.u32 2147483648, %v626_v32  ;;  %v636_v38 = vand.u32 2147483647, %v626_v32  ;;  %vm632_vm6 = vweird.f32 %v626_v32 }
 0x1bd   :  { %v639_v40 = vor.u32 1.1754944e-38, %v638_v36  ;;  %vm637_vm8 = vcmp.eq.f32.partialorder %v636_v38, 8.507059e+37 }
 0x1c1   :  { %v992_v33 = vpop.eup %991 }
 0x1c2   :  { %v628_v34 = vmul.f32 %v992_v33, %v626_v32  ;;  %vm633_vm3 = vweird.f32 %v992_v33 }
 0x1c3   :  { %vm634_vm7 = vmor %vm632_vm6, %vm633_vm3 }
 0x1c4   :  { %v629_v35 = vsub.f32 1.0, %v628_v34 }
 0x1c6   :  { %v630_v37 = vmul.f32 %v992_v33, %v629_v35 }
 0x1c8   :  { %v631_v39 = vadd.f32 %v992_v33, %v630_v37 }
 0x1ca   :  { %v635_v41 = vsel %vm634_vm7, %v992_v33, %v631_v39 }
 0x1cb   :  { %v640_v42 = vsel %vm637_vm8, %v639_v40, %v635_v41 }
 0x1cc   :  { %v644_v43 = vadd.f32 1e-08, %v640_v42  ;;  %v642_v44 = vmul.f32 2.0, %v640_v42 }
 0x1ce   :  { %v647_v45 = vsel %vm618_vm9, %v644_v43, %v610_v26  ;;  %v923_v46 = vadd.f32 -1.0, %v642_v44 }
 0x1d0   :  { %v648_v47 = vsel %vm615_vm2, %v923_v46, %v647_v45 }
 0x1d1   :  { %649 = vst [vmem:[#allocation2] sm:$0xff] %v648_v47 }
 0x1d2   :  { %660 = dma.vmem_to_hbm [thread:$0]  %s656_s8, 128, %s658_s11, [#allocation3]  }
 0x1d3   :  { %1017 = dma.done.wait [#allocation3], 128  }
 0x1d4   :  { %1018 = vsyncadd [#allocation3], 4294967168 }
 0x1d5   :  { %665 = vsyncpa [#allocation3], 1 }

</bundles_post_ra>
